<compile_context>
chip_gen: v5e
topology: v5e:2x2
jax: 0.10.0
libtpu: 0.0.40
codegen_flags: <defaults>
</compile_context>

<pallas_src>
import functools

import jax
import jax.numpy as jnp
from jax.experimental import pallas as pl
from jax.experimental.pallas import tpu as pltpu


# ----------------------------------------------------------------------------
# Kernels
# ----------------------------------------------------------------------------
def se_block_kernel(x_ref, w1_ref, w2_ref, o_ref, *, inv_hw):
    """Fused squeeze + MLP + excite for a (bb, C, HW) block (one read of x)."""
    x = x_ref[...]                                                    # (bb, C, HW)
    # Squeeze: f32-accumulating sum (no full-block f32 temporary), exact mean.
    pooled = jnp.sum(x, axis=-1, dtype=jnp.float32) * inv_hw          # (bb, C)
    # Excitation MLP: Linear -> ReLU -> Linear -> Sigmoid (no biases).
    h = jnp.dot(pooled, w1_ref[...].astype(jnp.float32),
                preferred_element_type=jnp.float32)
    h = jnp.maximum(h, 0.0)                                           # (bb, C_red)
    z = jnp.dot(h, w2_ref[...].astype(jnp.float32),
                preferred_element_type=jnp.float32)                   # (bb, C)
    s = jax.nn.sigmoid(z)
    # Excite in x's dtype: cast only the tiny gate, broadcast over HW lanes.
    o_ref[...] = x * s.astype(x.dtype)[:, :, None]


def se_gate_kernel(x_ref, w1_ref, w2_ref, s_ref, acc_ref, *, inv_hw, hw, hw_t):
    """Fallback pass 1: accumulate channel sums over HW tiles, emit gate at end."""
    t = pl.program_id(1)

    @pl.when(t == 0)
    def _():
        acc_ref[...] = jnp.zeros_like(acc_ref)

    x = x_ref[...]                                                    # (1, C, hw_t)
    # Mask the tail tile (data past HW in a boundary block is undefined).
    col = jax.lax.broadcasted_iota(jnp.int32, x.shape, dimension=2)
    valid = (t * hw_t + col) < hw
    xm = jnp.where(valid, x, jnp.zeros_like(x))
    acc_ref[...] += jnp.sum(xm, axis=-1, dtype=jnp.float32)           # (1, C)

    @pl.when(t == pl.num_programs(1) - 1)
    def _():
        pooled = acc_ref[...] * inv_hw                                # (1, C)
        h = jnp.maximum(
            jnp.dot(pooled, w1_ref[...].astype(jnp.float32),
                    preferred_element_type=jnp.float32), 0.0)
        z = jnp.dot(h, w2_ref[...].astype(jnp.float32),
                    preferred_element_type=jnp.float32)               # (1, C)
        s_ref[...] = jax.nn.sigmoid(z)[:, None, :].astype(s_ref.dtype)  # (1, 1, C)


def se_excite_kernel(x_ref, s_ref, o_ref):
    """Fallback pass 2: out = x * gate, spatially tiled."""
    x = x_ref[...]                                                    # (1, C, hw_t)
    gate = s_ref[...][:, 0, :, None].astype(x.dtype)                  # (1, C, 1)
    o_ref[...] = x * gate


# ----------------------------------------------------------------------------
# Hardware-aware sizing helpers
# ----------------------------------------------------------------------------
def _vmem_capacity_bytes():
    try:
        return int(pltpu.get_tpu_info().vmem_capacity_bytes)
    except Exception:
        try:
            kind = jax.devices()[0].device_kind.lower()
            return (64 << 20) if "v7" in kind else (128 << 20)
        except Exception:
            return 64 << 20  # conservative


def _num_tensorcores():
    try:
        d = jax.devices()[0]
        n = getattr(d, "num_cores", None)
        if n:
            return int(n)
        return 2 if "v7" in d.device_kind.lower() else 1
    except Exception:
        return 1


def _pick_block_b(batch, per_row_bytes, budget_bytes, n_cores):
    """Largest divisor of batch fitting the budget, preferring >= 2 grid steps
    per TensorCore so per-core double buffering hides the HBM DMA."""
    bb = max(1, min(batch, budget_bytes // max(per_row_bytes, 1)))
    while batch % bb:
        bb -= 1
    min_steps = min(batch, 2 * n_cores)
    while bb > 1 and (batch // bb) < min_steps:
        bb -= 1
        while batch % bb:
            bb -= 1
    return bb


# ----------------------------------------------------------------------------
# Wrapper
# ----------------------------------------------------------------------------
def se_block(x_nchw, w1_t, w2_t, *, force_spatial_tiling=False, forced_hw_tile=None):
    """x_nchw: (B, C, H, W); w1_t: (C, C//r); w2_t: (C//r, C) -> (B, C, H, W)."""
    B, C, H, W = x_nchw.shape
    C_red = w1_t.shape[1]
    HW = H * W

    x_flat = x_nchw.reshape(B, C, HW)                 # contiguous merge, no copy
    itemsize = jnp.dtype(x_flat.dtype).itemsize
    w_bytes = (C * C_red + C_red * C) * jnp.dtype(w1_t.dtype).itemsize

    cap = _vmem_capacity_bytes()
    if cap >= (128 << 20):        # v5e / v6e: use most of the 128 MiB
        data_budget, limit_cap = 96 << 20, 110 << 20
    else:                         # v7x (64 MiB): leave headroom for scratch
        data_budget, limit_cap = 36 << 20, 52 << 20
    n_cores = _num_tensorcores()

    # 2x double-buffered input + 2x double-buffered output blocks + slack.
    per_row = 5 * C * HW * itemsize
    fused_path = (per_row <= data_budget) and not force_spatial_tiling

    if fused_path:
        bb = _pick_block_b(B, per_row, data_budget, n_cores)
        block_bytes = bb * C * HW * itemsize
        needed = 4 * block_bytes + 2 * w_bytes + (6 << 20)
        vmem_limit = int(min(limit_cap, max(needed, 16 << 20)))

        kernel = functools.partial(se_block_kernel, inv_hw=1.0 / HW)
        out_flat = pl.pallas_call(
            kernel,
            out_shape=jax.ShapeDtypeStruct((B, C, HW), x_flat.dtype),
            grid=(B // bb,),
            in_specs=[
                pl.BlockSpec((bb, C, HW), lambda b: (b, 0, 0)),
                pl.BlockSpec((C, C_red), lambda b: (0, 0)),   # resident weights
                pl.BlockSpec((C_red, C), lambda b: (0, 0)),   # resident weights
            ],
            out_specs=pl.BlockSpec((bb, C, HW), lambda b: (b, 0, 0)),
            compiler_params=pltpu.CompilerParams(
                dimension_semantics=("parallel",),
                vmem_limit_bytes=vmem_limit,
            ),
        )(x_flat, w1_t, w2_t)
        return out_flat.reshape(B, C, H, W)

    # ---- Fallback: spatially tiled two-pass path (large C*H*W rows) --------
    if forced_hw_tile is not None:
        hw_t = int(forced_hw_tile)
    else:
        hw_t = max(128, (data_budget // (4 * C * itemsize)) // 128 * 128)
    hw_t = min(hw_t, ((HW + 127) // 128) * 128)
    n_hw = pl.cdiv(HW, hw_t)

    # Pass 1: per-batch channel gates (reduction over HW tiles, axis last).
    needed1 = 2 * C * hw_t * itemsize + 2 * w_bytes + (6 << 20)
    gate_kernel = functools.partial(se_gate_kernel, inv_hw=1.0 / HW, hw=HW, hw_t=hw_t)
    gates = pl.pallas_call(
        gate_kernel,
        out_shape=jax.ShapeDtypeStruct((B, 1, C), jnp.float32),
        grid=(B, n_hw),
        in_specs=[
            pl.BlockSpec((1, C, hw_t), lambda b, t: (b, 0, t)),
            pl.BlockSpec((C, C_red), lambda b, t: (0, 0)),
            pl.BlockSpec((C_red, C), lambda b, t: (0, 0)),
        ],
        out_specs=pl.BlockSpec((1, 1, C), lambda b, t: (b, 0, 0)),
        scratch_shapes=[pltpu.VMEM((1, C), jnp.float32)],
        compiler_params=pltpu.CompilerParams(
            dimension_semantics=("parallel", "arbitrary"),
            vmem_limit_bytes=int(min(limit_cap, max(needed1, 16 << 20))),
        ),
    )(x_flat, w1_t, w2_t)

    # Pass 2: excite (costs one extra read of x, but shape-robust on 64 MiB VMEM).
    needed2 = 4 * C * hw_t * itemsize + (6 << 20)
    out_flat = pl.pallas_call(
        se_excite_kernel,
        out_shape=jax.ShapeDtypeStruct((B, C, HW), x_flat.dtype),
        grid=(B, n_hw),
        in_specs=[
            pl.BlockSpec((1, C, hw_t), lambda b, t: (b, 0, t)),
            pl.BlockSpec((1, 1, C), lambda b, t: (b, 0, 0)),
        ],
        out_specs=pl.BlockSpec((1, C, hw_t), lambda b, t: (b, 0, t)),
        compiler_params=pltpu.CompilerParams(
            dimension_semantics=("parallel", "parallel"),
            vmem_limit_bytes=int(min(limit_cap, max(needed2, 16 << 20))),
        ),
    )(x_flat, gates)
    return out_flat.reshape(B, C, H, W)


# ----------------------------------------------------------------------------
# Self-test
# ----------------------------------------------------------------------------
if __name__ == "__main__":
    key = jax.random.PRNGKey(0)
    kx1, kx2, k1, k2 = jax.random.split(key, 4)

    def reference(x, w1, w2):
        pooled = jnp.mean(x, axis=(2, 3))
        h = jnp.maximum(pooled @ w1.T, 0.0)
        s = jax.nn.sigmoid(h @ w2.T)
        return x * s[:, :, None, None]

    B, C, reduction = 2, 64, 16
    C_red = C // reduction
    # PyTorch nn.Linear stores weight as (out_features, in_features) and
    # computes y @ W.T; build in PyTorch layout and pass the transposes.
    w1 = jax.random.normal(k1, (C_red, C), dtype=jnp.float32) * 0.1   # fc1.weight
    w2 = jax.random.normal(k2, (C, C_red), dtype=jnp.float32) * 0.1   # fc2.weight

    # Test 1: fused single-pass path, HW a multiple of 128 (16x16).
    x1 = jax.random.normal(kx1, (B, C, 16, 16), dtype=jnp.float32)
    out1 = jax.block_until_ready(se_block(x1, w1.T, w2.T))
    assert out1.shape == x1.shape
    assert jnp.allclose(out1, reference(x1, w1, w2), atol=1e-5, rtol=1e-5)

    # Test 2: fused path with HW NOT a multiple of 128 (15x15) — no pad/slice
    # HBM round-trips; Mosaic masks the partial lanes in-kernel.
    x2 = jax.random.normal(kx2, (B, C, 15, 15), dtype=jnp.float32)
    out2 = jax.block_until_ready(se_block(x2, w1.T, w2.T))
    assert jnp.allclose(out2, reference(x2, w1, w2), atol=1e-5, rtol=1e-5)

    # Test 3: spatial-tiled two-pass fallback, forced on the odd shape so the
    # large-row code path (incl. tail masking) is compiled and verified too.
    out3 = jax.block_until_ready(
        se_block(x2, w1.T, w2.T, force_spatial_tiling=True, forced_hw_tile=128))
    assert jnp.allclose(out3, reference(x2, w1, w2), atol=1e-5, rtol=1e-5)

    print("KERNEL_OK")
</pallas_src>

<mosaic_0001>
module attributes {stable_mosaic.version = 11 : i64} {
  func.func @se_block_kernel(%arg0: i32, %arg1: memref<1x64x256xf32, #tpu.memory_space<vmem>>, %arg2: memref<64x4xf32, #tpu.memory_space<vmem>>, %arg3: memref<4x64xf32, #tpu.memory_space<vmem>>, %arg4: memref<1x64x256xf32, #tpu.memory_space<vmem>>) attributes {dimension_semantics = [#tpu.dimension_semantics<parallel>], iteration_bounds = array<i64: 2>, scalar_prefetch = 0 : i64, scratch_operands = 0 : i64, tpu.core_type = #tpu.core_type<tc>, window_params = [{transform_indices = @transform_0, window_bounds = array<i64: 1, 64, 256>}, {pipeline_mode = #tpu.pipeline_mode<synchronous>, transform_indices = @transform_1, window_bounds = array<i64: 64, 4>}, {pipeline_mode = #tpu.pipeline_mode<synchronous>, transform_indices = @transform_2, window_bounds = array<i64: 4, 64>}, {transform_indices = @transform_3, window_bounds = array<i64: 1, 64, 256>}]} {
    %c0 = arith.constant 0 : index
    %c0_0 = arith.constant 0 : index
    %c0_1 = arith.constant 0 : index
    %0 = vector.load %arg1[%c0, %c0_0, %c0_1] : memref<1x64x256xf32, #tpu.memory_space<vmem>>, vector<1x64x256xf32>
    %cst = arith.constant dense<0.000000e+00> : vector<1x64xf32>
    %1 = vector.multi_reduction <add>, %0, %cst [2] : vector<1x64x256xf32> to vector<1x64xf32>
    %cst_2 = arith.constant 3.906250e-03 : f32
    %2 = vector.broadcast %cst_2 : f32 to vector<1x64xf32>
    %3 = arith.mulf %1, %2 : vector<1x64xf32>
    %c0_3 = arith.constant 0 : index
    %c0_4 = arith.constant 0 : index
    %4 = vector.load %arg2[%c0_3, %c0_4] : memref<64x4xf32, #tpu.memory_space<vmem>>, vector<64x4xf32>
    %cst_5 = arith.constant dense<0.000000e+00> : vector<1x4xf32>
    %5 = tpu.matmul %3, %4, %cst_5 {dimension_numbers = #tpu.dot_dimension_numbers<[1], [0], [0], [1], [0, 0, 1, 1], [], []>} : vector<1x64xf32>, vector<64x4xf32>, vector<1x4xf32> -> vector<1x4xf32>
    %cst_6 = arith.constant 0.000000e+00 : f32
    %6 = vector.broadcast %cst_6 : f32 to vector<1x4xf32>
    %7 = arith.maximumf %5, %6 : vector<1x4xf32>
    %c0_7 = arith.constant 0 : index
    %c0_8 = arith.constant 0 : index
    %8 = vector.load %arg3[%c0_7, %c0_8] : memref<4x64xf32, #tpu.memory_space<vmem>>, vector<4x64xf32>
    %cst_9 = arith.constant dense<0.000000e+00> : vector<1x64xf32>
    %9 = tpu.matmul %7, %8, %cst_9 {dimension_numbers = #tpu.dot_dimension_numbers<[1], [0], [0], [1], [0, 0, 1, 1], [], []>} : vector<1x4xf32>, vector<4x64xf32>, vector<1x64xf32> -> vector<1x64xf32>
    %10 = arith.negf %9 : vector<1x64xf32>
    %11 = math.exp %10 : vector<1x64xf32>
    %cst_10 = arith.constant 1.000000e+00 : f32
    %12 = vector.broadcast %cst_10 : f32 to vector<1x64xf32>
    %13 = arith.addf %12, %11 : vector<1x64xf32>
    %14 = arith.divf %12, %13 : vector<1x64xf32>
    %15 = vector.shape_cast %14 : vector<1x64xf32> to vector<1x64x1xf32>
    %16 = vector.broadcast %15 : vector<1x64x1xf32> to vector<1x64x256xf32>
    %17 = arith.mulf %0, %16 : vector<1x64x256xf32>
    %c0_11 = arith.constant 0 : index
    %c0_12 = arith.constant 0 : index
    %c0_13 = arith.constant 0 : index
    %18 = vector.load %arg4[%c0_11, %c0_12, %c0_13] : memref<1x64x256xf32, #tpu.memory_space<vmem>>, vector<1x64x256xf32>
    tpu.vector_store %arg4[%c0_11, %c0_12, %c0_13], %17 {strides = array<i32>} : memref<1x64x256xf32, #tpu.memory_space<vmem>>, vector<1x64x256xf32>,
    return
  }
  func.func @transform_0(%arg0: i32) -> (i32, i32, i32) {
    %c0_i32 = arith.constant 0 : i32
    %c0_i32_0 = arith.constant 0 : i32
    %c0_i32_1 = arith.constant 0 : i32
    return %arg0, %c0_i32, %c0_i32_0 : i32, i32, i32
  }
  func.func @transform_1(%arg0: i32) -> (i32, i32) {
    %c0_i32 = arith.constant 0 : i32
    %c0_i32_0 = arith.constant 0 : i32
    %c0_i32_1 = arith.constant 0 : i32
    return %c0_i32, %c0_i32_0 : i32, i32
  }
  func.func @transform_2(%arg0: i32) -> (i32, i32) {
    %c0_i32 = arith.constant 0 : i32
    %c0_i32_0 = arith.constant 0 : i32
    %c0_i32_1 = arith.constant 0 : i32
    return %c0_i32, %c0_i32_0 : i32, i32
  }
  func.func @transform_3(%arg0: i32) -> (i32, i32, i32) {
    %c0_i32 = arith.constant 0 : i32
    %c0_i32_0 = arith.constant 0 : i32
    %c0_i32_1 = arith.constant 0 : i32
    return %arg0, %c0_i32, %c0_i32_0 : i32, i32, i32
  }
}

</mosaic_0001>

<bundles_post_ra>
// kernel: tpu_custom_call.1
= control target key start
LH: loop header
LB: loop body
LE: loop exit
PB: predicated region body
PF: predicated region fallthrough
CT: control target
= control target key end

     0   :  { %8 = vsyncpa [#allocation3], 0  ;;  %s974_s0 = inlined_call_operand.hbm [shape: f32[2,64,256], index: 0, kind: input, shape index: {}]   ;;  %s975_s1 = inlined_call_operand.vmem [shape: f32[64,4], index: 1, kind: input, shape index: {}]   ;;  %s976_s2 = inlined_call_operand.vmem [shape: f32[4,64], index: 2, kind: input, shape index: {}]   ;;  %s977_s3 = inlined_call_operand.hbm [shape: f32[2,64,256], index: 3, kind: output, shape index: {}]  }
   0x1   :  { %10 = vsyncpa [#allocation3 + $0x1], 0 }
   0x2   :  { %11 = vsyncpa [#allocation4], 0 }
   0x3   :  { %13 = vsyncpa [#allocation4 + $0x1], 0  ;;  %s733_s12 = smov 0   ;;  %s735_s13 = smov 0  }
   0x4   :  { %s737_s14 = smov 0   ;;  %s739_s15 = smov 0  }
   0x5 LB: > { %s754_s16 = sadd.s32 4294967295, %s707_s15   ;;  %s528_s17 = sadd.s32 4294967294, %s707_s15   ;;  %s707_s15 = sphi %s739_s15, %s987_s15   ;;  %s703_s14 = sphi %s737_s14, %s986_s14   ;;  %s699_s13 = sphi %s735_s13, %s985_s13   ;;  %s695_s12 = sphi %s733_s12, %s984_s12  }
   0x6   : > { %s758_s18 = sadd.s32 1, %s707_s15   ;;  %s26_s19 = sadd.s32 1, %s703_s14 }
   0x7   : > { %s23_s20 = ssub.s32 %s707_s15, %s758_s18  ;;  %p33_p0 = scmp.ne.s32.totalorder %s703_s14, %s699_s13 }
   0x8   : > { %p24_p1 = scmp.eq.s32.totalorder %s23_s20, 0  ;;  %p34_p2 = scmp.eq.s32.totalorder %s707_s15, 0 }
   0x9   : > { %p39_p3 = scmp.ne.s32.totalorder %s699_s13, %s695_s12  ;;  %p40_p4 = scmp.eq.s32.totalorder %s754_s16, 0 }
   0xa   : > { %s770_s21 = scalar_select %p24_p1, %s703_s14, %s26_s19  }
   0xb   : > { %p772_p5 = por %p34_p2, %p33_p0  ;;  %p776_p6 = por %p40_p4, %p39_p3 }
   0xc   : > { %p105_p7 = scmp.eq.s32.totalorder %s754_s16, 1  ;;  %p111_p8 = scmp.eq.s32.totalorder %s528_s17, 1 }
   0xd   : > { %p560_p10 = scmp.lt.s32.totalorder %s707_s15, 2  ;;  %s137_s26 = sand.u32 1, %s703_s14  }
   0xe   : > { %p783_p11 = por %p105_p7, %p33_p0  ;;  %p787_p12 = por %p111_p8, %p39_p3 }
   0xf   : > { %s546_s27 = sshll.u32 %s707_s15, 7  ;;  %s531_s28 = sshll.u32 %s137_s26, 7 }
  0x10   : > { %s146_s4 = scalar_lea.hbm %s974_s0, %s546_s27  ;;  %s141_s6 = scalar_lea.vmem [#allocation2], %s531_s28 }
  0x11   : > { %s147_s5 = sshll.u32 %s146_s4, 4  ;;  %s149_s7 = sshll.u32 %s141_s6, 4  ;;  %s148_s5 = int_to_ptr.hbm [resolvable:$true] %s147_s5  ;;  %s150_s7 = int_to_ptr.vmem [resolvable:$true] %s149_s7 }
  0x12   : > { %p798_p13 = pnand %p560_p10, %p772_p5  ;;  %p534_p0 = scmp.ge.s32.totalorder %s707_s15, 1 }
  0x13   : > { %p157_p1 = scmp.lt.s32.totalorder %s707_s15, 3  ;;  %s138_s9 = scalar_lea.sflag [#allocation3], %s137_s26 }
  0x14   : > { %s611_s10 = sshra.s32 %s148_s5, 4  ;;  %p615_p3 = pneg %p798_p13  ;;  %s612_s10 = int_to_ptr.hbm [resolvable:$true] %s611_s10 }
  0x15   : > { %s613_s11 = scalar_lea.hbm %s612_s10, 128  ;;  %s618_s20 = scalar_lea.hbm %s974_s0, 256 }
  0x16   : > { %p614_p2 = scmp.ne.s32.totalorder %s612_s10, %s613_s11  ;;  %p619_p5 = scmp.lt.s32.totalorder %s612_s10, %s974_s0 }
  0x17   : > { %p620_p8 = scmp.lt.s32.totalorder %s618_s20, %s613_s11 }
  0x18   : > { %p616_p4 = pnand %p615_p3, %p614_p2 }
  0x19   : > { %p621_p10 = por %p620_p8, %p619_p5 }
  0x1a   : > { %p617_p7 = pneg %p616_p4 }
  0x1c   : > { %p622_p9 = pnand %p621_p10, %p617_p7 }
  0x1e   : > { %625 = shalt.err (!%p622_p9)
}
  0x1f   : > { %s709_s26 = smov 256   ;;  %s710_s28 = smov 16  }
  0x20   : > { %555 = dma.hbm_to_vmem [thread:$0]  (!%p798_p13), %s148_s5, 2048, %s150_s7, %s138_s9, %s709_s26, %s709_s26, %s710_s28  }
  0x21   : > { %p158_p2 = pnand %p534_p0, %p157_p1 }
  0x22   : > { %s819_s29 = sand.u32 (!%p158_p2), 1, %s699_s13  }
  0x23   : > { %161 = sbr.rel (%p158_p2) target bundleno = 620 (0x26c), region = 32  ;;  %s535_s30 = sshll.u32 (!%p158_p2), %s819_s29, 7 }
  0x24   : > { %s164_s4 = scalar_lea.sflag (!%p158_p2), [#allocation3], %s819_s29  ;;  %s167_s6 = scalar_lea.vmem (!%p158_p2), [#allocation2], %s535_s30 }
  0x28   : > { %686 = dma.done.wait (%p776_p6), %s164_s4, 2048  }
  0x29   : > { %688 = vsyncadd (%p776_p6), %s164_s4, 4294965248  ;;  %v829_v0 = vld [vmem:[%s167_s6] sm:$0xff]  ;;  %v831_v1 = vld [vmem:[%s167_s6 + $0x8] sm:$0xff]  ;;  %v255_v32 = vlaneseq  ;;  %vm260_vm0 = vcmask 130112   ;;  %vm264_vm1 = vcmask 195712   ;;  %vm268_vm2 = vcmask 261312  }
  0x2a   : > { %v833_v2 = vld [vmem:[%s167_s6 + $0x20] sm:$0xff]  ;;  %v207_v3 = vadd.f32 %v831_v1, %v829_v0  ;;  %v837_v4 = vld [vmem:[%s167_s6 + $0x28] sm:$0xff]  ;;  %v847_v9 = vld [vmem:[%s167_s6 + $0x10] sm:$0xff]  ;;  %vm272_vm3 = vcmask 326912   ;;  %vm276_vm4 = vcmask 392512   ;;  %vm280_vm5 = vcmask 458112  }
  0x2b   : > { %v839_v5 = vld [vmem:[%s167_s6 + $0x40] sm:$0xff]  ;;  %v841_v6 = vld [vmem:[%s167_s6 + $0x48] sm:$0xff]  ;;  %v213_v7 = vadd.f32 %v837_v4, %v833_v2  ;;  %v849_v10 = vld [vmem:[%s167_s6 + $0x18] sm:$0xff]  ;;  %v256_v36 = vand.u32 127, %v255_v32  ;;  %vm284_vm6 = vcmask 523712   ;;  %vm286_vm7 = vcmask 523264  }
  0x2c   : > { %v219_v8 = vadd.f32 %v841_v6, %v839_v5  ;;  %208 = vadd.xlane.f32.xlu0 %v207_v3  ;;  %v851_v11 = vld [vmem:[%s167_s6 + $0x30] sm:$0xff]  ;;  %v853_v12 = vld [vmem:[%s167_s6 + $0x38] sm:$0xff]  ;;  %v210_v15 = vadd.f32 %v849_v10, %v847_v9  ;;  %v865_v18 = vld [vmem:[%s167_s6 + $0x60] sm:$0xff]  ;;  %vm315_vm8 = vcmask 1043456   ;;  %vm311_vm9 = vcmask 31744   ;;  %s908_s7 = scalar_lea.vmem [#allocation5], %s535_s30 }
  0x2d   : > { %214 = vadd.xlane.f32.xlu1 %v213_v7  ;;  %v855_v13 = vld [vmem:[%s167_s6 + $0x50] sm:$0xff]  ;;  %v857_v14 = vld [vmem:[%s167_s6 + $0x58] sm:$0xff]  ;;  %v216_v16 = vadd.f32 %v853_v12, %v851_v11  ;;  %v867_v19 = vld [vmem:[%s167_s6 + $0x68] sm:$0xff]  ;;  %v258_v38 = vadd.s32 4294967288, %v256_v36  ;;  %v262_v39 = vadd.s32 4294967280, %v256_v36  ;;  %v266_v42 = vadd.s32 4294967272, %v256_v36 }
  0x2e   : > { %220 = vadd.xlane.f32.xlu2 %v219_v8  ;;  %v222_v17 = vadd.f32 %v857_v14, %v855_v13  ;;  %v869_v20 = vld [vmem:[%s167_s6 + $0x70] sm:$0xff]  ;;  %v871_v21 = vld [vmem:[%s167_s6 + $0x78] sm:$0xff]  ;;  %v225_v22 = vadd.f32 %v867_v19, %v865_v18  ;;  %v244_v26 = vld [vmem:[%s975_s1 + $0x28] sm:$0xff]  ;;  %v270_v46 = vadd.s32 4294967264, %v256_v36  ;;  %v274_v53 = vadd.s32 4294967256, %v256_v36  ;;  %s547_s30 = sshll.u32 %s754_s16, 7 }
  0x2f   : > { %v228_v23 = vadd.f32 %v871_v21, %v869_v20  ;;  %v246_v24 = vld [vmem:[%s975_s1 + $0x38] sm:$0xff]  ;;  %v245_v25 = vld [vmem:[%s975_s1 + $0x30] sm:$0xff]  ;;  %v243_v27 = vld [vmem:[%s975_s1 + $0x20] sm:$0xff]  ;;  %v278_v59 = vadd.s32 4294967248, %v256_v36  ;;  %v282_v62 = vadd.s32 4294967240, %v256_v36  ;;  %s451_s10 = scalar_lea.hbm %s977_s3, %s547_s30  ;;  %s452_s11 = sshll.u32 %s908_s7, 4  ;;  %s453_s11 = int_to_ptr.vmem [resolvable:$true] %s452_s11 }
  0x30   : > { %297 = vmatpush.msra.mxu0 %v246_v24  ;;  %v242_v28 = vld [vmem:[%s975_s1 + $0x18] sm:$0xff]  ;;  %v241_v29 = vld [vmem:[%s975_s1 + $0x10] sm:$0xff]  ;;  %v240_v30 = vld [vmem:[%s975_s1 + $0x8] sm:$0xff]  ;;  %s454_s17 = sshll.u32 %s451_s10, 4  ;;  %s440_s16 = scalar_lea.sflag [#allocation4], %s819_s29  ;;  %s455_s17 = int_to_ptr.hbm [resolvable:$true] %s454_s17 }
  0x31   : > { %v239_v31 = vld [vmem:[%s975_s1] sm:$0xff]  ;;  %s655_s19 = sshra.s32 %s455_s17, 4  ;;  %s661_s26 = scalar_lea.hbm %s977_s3, 256  ;;  %s656_s19 = int_to_ptr.hbm [resolvable:$true] %s655_s19 }
  0x32   : > { %298 = vmatpush.msra.mxu0 %v245_v25  ;;  %v310_v24 = vld [vmem:[%s976_s2] sm:$0xf]  ;;  %s657_s20 = scalar_lea.hbm %s656_s19, 128  ;;  %p662_p0 = scmp.lt.s32.totalorder %s656_s19, %s977_s3 }
  0x33   : > { %538 = vmatpush.msk.msra.mxu1 %vm315_vm8, %v310_v24  ;;  %p658_p6 = scmp.ne.s32.totalorder %s656_s19, %s657_s20  ;;  %p663_p1 = scmp.lt.s32.totalorder %s661_s26, %s657_s20 }
  0x34   : > { %211 = vadd.xlane.f32.xlu0 %v210_v15  ;;  %299 = vmatpush.msra.mxu0 %v244_v26 }
  0x35   : > { %217 = vadd.xlane.f32.xlu1 %v216_v16  ;;  %p659_p9 = pnand %p658_p6, %p783_p11  ;;  %p664_p3 = por %p663_p1, %p662_p0 }
  0x36   : > { %223 = vadd.xlane.f32.xlu2 %v222_v17  ;;  %300 = vmatpush.msra.mxu0 %v243_v27  ;;  %v360_v27 = vshrl.u32 %v255_v32, 7 }
  0x37   : > { %p660_p13 = pneg %p659_p9 }
  0x38   : > { %301 = vmatpush.msra.mxu0 %v242_v28  ;;  %598 = vset.pattern.permute.xlu2 %v360_v27  ;;  %v373_v28 = vadd.s32 16, %v360_v27 }
  0x39   : > { %p665_p4 = pnand %p664_p3, %p660_p13 }
  0x3a   : > { %302 = vmatpush.msra.mxu0 %v241_v29  ;;  %v367_v29 = vadd.s32 8, %v360_v27  ;;  %600 = vset.pattern.permute.xlu1 %v373_v28 }
  0x3c   : > { %226 = vadd.xlane.f32.xlu0 %v225_v22  ;;  %303 = vmatpush.msra.mxu0 %v240_v30 }
  0x3d   : > { %229 = vadd.xlane.f32.xlu1 %v228_v23  ;;  %599 = vset.pattern.permute.xlu0 %v367_v29 }
  0x3e   : > { %304 = vmatpush.msra.mxu0 %v239_v31 }
  0x9f   : > { %v209_v33 = vpop.xlane.xlu0 %208 }
  0xa0   : > { %v215_v34 = vpop.xlane.xlu1 %214  ;;  %v231_v37 = vmul.f32 0.00390625, %v209_v33 }
  0xa1   : > { %v221_v35 = vpop.xlane.xlu2 %220  ;;  %v233_v40 = vmul.f32 0.00390625, %v215_v34 }
  0xa2   : > { %v257_v48 = vperm.slane %v231_v37, %v256_v36  ;;  %v235_v49 = vmul.f32 0.00390625, %v221_v35 }
  0xa3   : > { %v263_v51 = vperm.slane %v233_v40, %v262_v39 }
  0xa4   : > { %v271_v57 = vperm.slane %v235_v49, %v270_v46  ;;  %v379_v46 = vadd.s32 24, %v360_v27  ;;  %v397_v49 = vadd.s32 48, %v360_v27 }
  0xa7   : > { %v212_v41 = vpop.xlane.xlu0 %211 }
  0xa8   : > { %v232_v43 = vmul.f32 0.00390625, %v212_v41  ;;  %v218_v44 = vpop.xlane.xlu1 %217 }
  0xa9   : > { %v224_v45 = vpop.xlane.xlu2 %223  ;;  %v234_v47 = vmul.f32 0.00390625, %v218_v44 }
  0xaa   : > { %v259_v50 = vperm.slane %v232_v43, %v258_v38  ;;  %v236_v54 = vmul.f32 0.00390625, %v224_v45  ;;  %v391_v45 = vadd.s32 40, %v360_v27 }
  0xab   : > { %v267_v52 = vperm.slane %v234_v47, %v266_v42  ;;  %v403_v47 = vadd.s32 56, %v360_v27 }
  0xac   : > { %v261_v55 = vsel %vm260_vm0, %v259_v50, %v257_v48  ;;  %v275_v60 = vperm.slane %v236_v54, %v274_v53  ;;  %v385_v48 = vadd.s32 32, %v360_v27 }
  0xad   : > { %v265_v56 = vsel %vm264_vm1, %v263_v51, %v261_v55 }
  0xae   : > { %v269_v58 = vsel %vm268_vm2, %v267_v52, %v265_v56 }
  0xaf   : > { %v227_v61 = vpop.xlane.xlu0 %226  ;;  %v273_v7 = vsel %vm272_vm3, %v271_v57, %v269_v58 }
  0xb0   : > { %v237_v63 = vmul.f32 0.00390625, %v227_v61  ;;  %v230_v3 = vpop.xlane.xlu1 %229  ;;  %v277_v17 = vsel %vm276_vm4, %v275_v60, %v273_v7 }
  0xb1   : > { %v238_v8 = vmul.f32 0.00390625, %v230_v3 }
  0xb2   : > { %v279_v15 = vperm.slane %v237_v63, %v278_v59 }
  0xb3   : > { %v283_v16 = vperm.slane %v238_v8, %v282_v62 }
  0xb4   : > { %v281_v22 = vsel %vm280_vm5, %v279_v15, %v277_v17 }
  0xb5   : > { %v285_v23 = vsel %vm284_vm6, %v283_v16, %v281_v22 }
  0xb6   : > { %537 = vmatmul.msk.f32.vlgmr.msra.gmra.mxu0 %vm286_vm7, %v285_v23 }
 0x133   : > { %v306_v25 = vpop.f32.mrf.mxu0 }
 0x134   : > { %v309_v26 = vmax.f32 %v306_v25, 0.0 }
 0x136   : > { %539 = vmatmul.msk.f32.vlgmr.msra.gmra.mxu1 %vm311_vm9, %v309_v26 }
 0x1b3   : > { %v336_v30 = vpop.f32.mrf.mxu1 }
 0x1b4   : > { %v540_v31 = vmul.f32 -1.442695, %v336_v30 }
 0x1b6   : > { %607 = vpow2.f32 %v540_v31 }
 0x1bc   : > { %v608_v33 = vpop.eup %607 }
 0x1bd   : > { %v342_v34 = vadd.f32 1.0, %v608_v33 }
 0x1bf   : > { %609 = vrcp.f32 %v342_v34  ;;  %v354_v38 = vand.u32 2147483648, %v342_v34  ;;  %v352_v40 = vand.u32 2147483647, %v342_v34  ;;  %vm348_vm11 = vweird.f32 %v342_v34 }
 0x1c1   : > { %v355_v32 = vor.u32 1.1754944e-38, %v354_v38  ;;  %vm353_vm13 = vcmp.eq.f32.partialorder %v352_v40, 8.507059e+37 }
 0x1c5   : > { %v610_v35 = vpop.eup %609 }
 0x1c6   : > { %v344_v36 = vmul.f32 %v610_v35, %v342_v34  ;;  %vm349_vm10 = vweird.f32 %v610_v35 }
 0x1c7   : > { %vm350_vm12 = vmor %vm348_vm11, %vm349_vm10 }
 0x1c8   : > { %v345_v37 = vsub.f32 1.0, %v344_v36 }
 0x1ca   : > { %v346_v39 = vmul.f32 %v610_v35, %v345_v37 }
 0x1cc   : > { %v347_v41 = vadd.f32 %v610_v35, %v346_v39 }
 0x1ce   : > { %v351_v42 = vsel %vm350_vm12, %v610_v35, %v347_v41 }
 0x1cf   : > { %v356_v43 = vsel %vm353_vm13, %v355_v32, %v351_v42 }
 0x1d0   : > { %v358_v44 = vperm.slane %v356_v43, 0 }
 0x1d2   : > { %375 = vperm.xlu1 %600, %v358_v44   ;;  %369 = vperm.xlu0 %599, %v358_v44  }
 0x1d3   : > { %363 = vperm.xlu2 %598, %v358_v44  }
 0x1da   : > { %603 = vset.pattern.permute.xlu1 %v391_v45  ;;  %606 = vset.pattern.permute.xlu0 %v403_v47 }
 0x1db   : > { %601 = vset.pattern.permute.xlu2 %v379_v46 }
 0x1e2   : > { %393 = vperm.xlu1 %603, %v358_v44  }
 0x1e3   : > { %381 = vperm.xlu2 %601, %v358_v44  }
 0x1ea   : > { %605 = vset.pattern.permute.xlu1 %v403_v47 }
 0x1eb   : > { %602 = vset.pattern.permute.xlu2 %v385_v48 }
 0x1f2   : > { %405 = vperm.xlu1 %605, %v358_v44  }
 0x1f3   : > { %387 = vperm.xlu2 %602, %v358_v44  }
 0x1fb   : > { %604 = vset.pattern.permute.xlu2 %v397_v49 }
 0x203   : > { %399 = vperm.xlu2 %604, %v358_v44  }
 0x22d   : > { %v364_v50 = vpop.permute.xlu2 %363 }
 0x22e   : > { %v407_v51 = vmul.f32 %v364_v50, %v829_v0  ;;  %v408_v52 = vmul.f32 %v364_v50, %v831_v1 }
 0x230   : > { %423 = vst [vmem:[%s908_s7] sm:$0xff] %v407_v51 }
 0x231   : > { %424 = vst [vmem:[%s908_s7 + $0x8] sm:$0xff] %v408_v52 }
 0x23d   : > { %v382_v53 = vpop.permute.xlu2 %381 }
 0x23e   : > { %v413_v54 = vmul.f32 %v382_v53, %v851_v11  ;;  %v414_v0 = vmul.f32 %v382_v53, %v853_v12 }
 0x240   : > { %429 = vst [vmem:[%s908_s7 + $0x30] sm:$0xff] %v413_v54 }
 0x241   : > { %430 = vst [vmem:[%s908_s7 + $0x38] sm:$0xff] %v414_v0 }
 0x244   : > { %v376_v1 = vpop.permute.xlu1 %375  ;;  %v370_v55 = vpop.permute.xlu0 %369 }
 0x245   : > { %v411_v56 = vmul.f32 %v376_v1, %v833_v2  ;;  %v412_v57 = vmul.f32 %v376_v1, %v837_v4  ;;  %v409_v58 = vmul.f32 %v370_v55, %v847_v9  ;;  %v410_v59 = vmul.f32 %v370_v55, %v849_v10 }
 0x247   : > { %427 = vst [vmem:[%s908_s7 + $0x20] sm:$0xff] %v411_v56 }
 0x248   : > { %428 = vst [vmem:[%s908_s7 + $0x28] sm:$0xff] %v412_v57 }
 0x249   : > { %425 = vst [vmem:[%s908_s7 + $0x10] sm:$0xff] %v409_v58 }
 0x24a   : > { %426 = vst [vmem:[%s908_s7 + $0x18] sm:$0xff] %v410_v59 }
 0x24d   : > { %v388_v11 = vpop.permute.xlu2 %387 }
 0x24e   : > { %v415_v12 = vmul.f32 %v388_v11, %v839_v5  ;;  %v416_v2 = vmul.f32 %v388_v11, %v841_v6 }
 0x250   : > { %431 = vst [vmem:[%s908_s7 + $0x40] sm:$0xff] %v415_v12 }
 0x251   : > { %432 = vst [vmem:[%s908_s7 + $0x48] sm:$0xff] %v416_v2 }
 0x254   : > { %v394_v4 = vpop.permute.xlu1 %393 }
 0x255   : > { %v417_v9 = vmul.f32 %v394_v4, %v855_v13  ;;  %v418_v60 = vmul.f32 %v394_v4, %v857_v14 }
 0x257   : > { %433 = vst [vmem:[%s908_s7 + $0x50] sm:$0xff] %v417_v9 }
 0x258   : > { %434 = vst [vmem:[%s908_s7 + $0x58] sm:$0xff] %v418_v60 }
 0x25d   : > { %v400_v10 = vpop.permute.xlu2 %399 }
 0x25e   : > { %v419_v61 = vmul.f32 %v400_v10, %v865_v18  ;;  %v420_v5 = vmul.f32 %v400_v10, %v867_v19 }
 0x260   : > { %435 = vst [vmem:[%s908_s7 + $0x60] sm:$0xff] %v419_v61 }
 0x261   : > { %436 = vst [vmem:[%s908_s7 + $0x68] sm:$0xff] %v420_v5 }
 0x264   : > { %v406_v6 = vpop.permute.xlu1 %405 }
 0x265   : > { %v421_v13 = vmul.f32 %v406_v6, %v869_v20  ;;  %v422_v14 = vmul.f32 %v406_v6, %v871_v21 }
 0x267   : > { %437 = vst [vmem:[%s908_s7 + $0x70] sm:$0xff] %v421_v13 }
 0x268   : > { %438 = vst [vmem:[%s908_s7 + $0x78] sm:$0xff] %v422_v14 }
 0x269   : > { %668 = shalt.err (!%p665_p4)
}
 0x26a   : > { %s711_s29 = smov 256   ;;  %s712_s6 = smov 16  }
 0x26b   : > { %550 = dma.vmem_to_hbm [thread:$0]  (%p783_p11), %s453_s11, 2048, %s455_s17, %s440_s16, %s711_s29, %s711_s29, %s712_s6  }
 0x26c PF: > { %s469_s23 = sand.u32 1, %s695_s12   ;;  %p983_p7 = scmp.ge.s32.totalorder %s707_s15, 2 }
 0x26d   : > { %s470_s5 = scalar_lea.sflag [#allocation4], %s469_s23 }
 0x26e   : > { %p557_p5 = pnand %p983_p7, %p787_p12 }
 0x270   : > { %p558_p8 = pneg %p557_p5 }
 0x272   : > { %690 = dma.done.wait (%p558_p8), %s470_s5, 2048  }
 0x273   : > { %692 = vsyncadd (%p558_p8), %s470_s5, 4294965248  ;;  %p16_p10 = scmp.ge.s32.totalorder %s758_s18, 4   ;;  %s984_s12 = smov %s699_s13 }
 0x274   : > { %s985_s13 = smov %s703_s14  ;;  %s986_s14 = smov %s770_s21 }
 0x275   : > { %s987_s15 = smov %s758_s18  ;;  %18 = sbr.rel (!%p16_p10) target bundleno = 5 (0x5), region = 77 }
 0x27a   :  { %476 = vsyncpa [#allocation3], 1 }
 0x27b   :  { %478 = vsyncpa [#allocation3 + $0x1], 1 }
 0x27c   :  { %479 = vsyncpa [#allocation4], 1 }
 0x27d   :  { %481 = vsyncpa [#allocation4 + $0x1], 1 }

</bundles_post_ra>
